<compile_context>
chip_gen: v7x
topology: tpu7x:2x2x1
jax: 0.10.0
libtpu: 0.0.40
codegen_flags: <defaults>
</compile_context>

<pallas_src>
import math

import jax
import jax.numpy as jnp
from jax.experimental import pallas as pl
from jax.experimental.pallas import tpu as pltpu

_LN10000 = math.log(10000.0)


def _round_up(a, b):
    return ((a + b - 1) // b) * b


def _make_kernel(ts, B, D, out_dtype):
    neg_scale = -_LN10000 / float(D)  # divisor is the true d_model

    def kernel(pos_ref, x_ref, o_ref):
        # pos_ref: (1,) int32 in SMEM.  x_ref / o_ref: (ts, B*D) lane-dense tiles.
        # Global sequence index of this tile's first row (runtime pos + grid offset).
        row0 = pl.program_id(0) * ts + pos_ref[0]
        t = (jax.lax.broadcasted_iota(jnp.int32, (ts, 1), 0) + row0).astype(jnp.float32)
        # div_term over the model dim; computed once per lane column (cheap EUP work).
        d = jax.lax.broadcasted_iota(jnp.int32, (1, D), 1).astype(jnp.float32)
        div = jnp.exp(d * neg_scale)                    # (1, D)
        ang = t * div                                   # (ts, D) via broadcast
        pe = jnp.sin(ang) + jnp.cos(ang)                # (ts, D), f32
        # Replicate across the B batch replicas of the flattened (B, D) -> B*D row.
        pe_bd = jnp.tile(pe, (1, B)) if B > 1 else pe   # (ts, B*D)
        o_ref[...] = (x_ref[...].astype(jnp.float32) + pe_bd).astype(out_dtype)
        # TODO(synk): nn.Dropout(p=0.1) is identity in eval mode; training-time
        # stochastic dropout (pltpu.prng_*) intentionally omitted.

    return kernel


def positional_encoding(x, pos=0, *, tile_bytes=2 * 1024 * 1024):
    """x: (seq, batch, d_model) — PyTorch batch_first=False layout (eval mode).

    Returns x + pe[pos:pos+seq, None, :].  `pos` may be a Python int or a JAX
    scalar; it is passed to the kernel at runtime (no per-pos recompiles).
    """
    S, B, D = x.shape
    BD = B * D
    itemsize = x.dtype.itemsize

    # ---- seq-tile sizing from the padded, double-buffered VMEM footprint -----
    sub = 8 * max(1, 4 // itemsize)        # sublane packing: 8 f32 / 16 bf16 / 32 int8
    lane_pad_bd = _round_up(BD, 128)       # lane padding of the (ts, B*D) tile
    row_bytes = lane_pad_bd * itemsize
    ts = max(sub, ((tile_bytes // row_bytes) // sub) * sub)
    # Keep >= 2 seq tiles whenever S allows so "parallel" can shard the grid
    # across v7x's two TensorCores.
    ts = min(ts, _round_up(pl.cdiv(S, 2), sub))
    if ts >= S:
        ts = S                             # single full-extent block (always legal)
    grid = (pl.cdiv(S, ts),)

    # Explicit VMEM budget: double-buffered x + out tiles plus headroom for the
    # f32 temporaries, well under v7x's 64 MiB physical VMEM and above v5e's
    # 16 MiB default scoped limit when needed.
    tile_pad_bytes = _round_up(ts, sub) * lane_pad_bd * itemsize
    tile_f32_bytes = _round_up(ts, sub) * lane_pad_bd * 4
    vmem_limit = 2 * 2 * tile_pad_bytes + 4 * tile_f32_bytes + (2 << 20)
    vmem_limit = int(min(max(vmem_limit, 8 << 20), 48 << 20))

    pos_arr = jnp.reshape(jnp.asarray(pos, dtype=jnp.int32), (1,))
    x2d = x.reshape(S, BD)                 # lane-dense slab (last dim = B*D)

    out2d = pl.pallas_call(
        _make_kernel(ts, B, D, x.dtype),
        out_shape=jax.ShapeDtypeStruct((S, BD), x.dtype),
        grid_spec=pltpu.PrefetchScalarGridSpec(
            num_scalar_prefetch=1,         # pos lives in SMEM; runtime value
            grid=grid,
            in_specs=[pl.BlockSpec((ts, BD), lambda s, pos_ref: (s, 0))],
            out_specs=pl.BlockSpec((ts, BD), lambda s, pos_ref: (s, 0)),
        ),
        compiler_params=pltpu.CompilerParams(
            dimension_semantics=("parallel",),
            vmem_limit_bytes=vmem_limit,
        ),
        # Inputs are (pos_arr, x2d): alias x2d -> output, add is done in place.
        input_output_aliases={1: 0},
        cost_estimate=pl.CostEstimate(
            flops=2 * S * BD,
            transcendentals=3 * S * D,
            bytes_accessed=2 * S * BD * itemsize,
        ),
    )(pos_arr, x2d)

    return out2d.reshape(S, B, D)


def _reference(x, pos=0):
    """Pure-JAX reference mirroring the PyTorch module (eval mode)."""
    S, B, D = x.shape
    position = jnp.arange(S, dtype=jnp.float32)[:, None] + float(pos)      # (S, 1)
    div_term = jnp.exp(jnp.arange(D, dtype=jnp.float32)
                       * (-math.log(10000.0) / D))                         # (D,)
    angle = position * div_term                                            # (S, D)
    pe = jnp.sin(angle) + jnp.cos(angle)                                   # (S, D)
    return (x.astype(jnp.float32) + pe[:, None, :]).astype(x.dtype)


if __name__ == "__main__":
    key = jax.random.PRNGKey(0)
    k1, k2 = jax.random.split(key)

    # Case 1: small shape in the module's (seq, batch, d_model) layout.
    S, B, D = 8, 2, 32
    x = jax.random.normal(k1, (S, B, D), dtype=jnp.float32)
    ref = _reference(x, pos=0)                        # ref first (x2d is aliased)
    out = jax.block_until_ready(positional_encoding(x, pos=0))
    assert out.shape == x.shape and out.dtype == x.dtype
    assert jnp.allclose(out, ref, atol=2e-4, rtol=2e-4)

    # Case 2: multi-block seq grid (partial last block) and a runtime pos scalar.
    S2 = 44
    x2 = jax.random.normal(k2, (S2, B, D), dtype=jnp.float32)
    ref2 = _reference(x2, pos=3)
    out2 = jax.block_until_ready(
        positional_encoding(x2, pos=jnp.int32(3), tile_bytes=4096))
    assert out2.shape == x2.shape
    assert jnp.allclose(out2, ref2, atol=2e-4, rtol=2e-4)

    print("KERNEL_OK")
</pallas_src>

<mosaic_0001>
module attributes {stable_mosaic.version = 11 : i64} {
  func.func @kernel(%arg0: i32, %arg1: memref<1xi32, #tpu.memory_space<smem>>, %arg2: memref<8x64xf32, #tpu.memory_space<vmem>>, %arg3: memref<8x64xf32, #tpu.memory_space<vmem>>) attributes {dimension_semantics = [#tpu.dimension_semantics<parallel>], iteration_bounds = array<i64: 1>, scalar_prefetch = 1 : i64, scratch_operands = 0 : i64, tpu.core_type = #tpu.core_type<tc>, window_params = [{transform_indices = @transform_0, window_bounds = array<i64: 8, 64>}, {transform_indices = @transform_1, window_bounds = array<i64: 8, 64>}]} {
    %c8_i32 = arith.constant 8 : i32
    %0 = arith.muli %arg0, %c8_i32 : i32
    %c0 = arith.constant 0 : index
    %1 = memref.load %arg1[%c0] : memref<1xi32, #tpu.memory_space<smem>>
    %2 = arith.addi %0, %1 : i32
    %3 = tpu.iota {dimensions = array<i32: 0>} : vector<8x1xi32>
    %4 = vector.broadcast %2 : i32 to vector<8x1xi32>
    %5 = arith.addi %3, %4 : vector<8x1xi32>
    %6 = arith.sitofp %5 : vector<8x1xi32> to vector<8x1xf32>
    %7 = tpu.iota {dimensions = array<i32: 1>} : vector<1x32xi32>
    %8 = arith.sitofp %7 : vector<1x32xi32> to vector<1x32xf32>
    %cst = arith.constant -0.287823141 : f32
    %9 = vector.broadcast %cst : f32 to vector<1x32xf32>
    %10 = arith.mulf %8, %9 : vector<1x32xf32>
    %11 = math.exp %10 : vector<1x32xf32>
    %12 = vector.broadcast %6 : vector<8x1xf32> to vector<8x32xf32>
    %13 = vector.broadcast %11 : vector<1x32xf32> to vector<8x32xf32>
    %14 = arith.mulf %12, %13 : vector<8x32xf32>
    %15 = math.sin %14 : vector<8x32xf32>
    %16 = math.cos %14 : vector<8x32xf32>
    %17 = arith.addf %15, %16 : vector<8x32xf32>
    %18 = tpu.concatenate %17, %17 in 1 : vector<8x32xf32>, vector<8x32xf32> -> vector<8x64xf32>
    %c0_0 = arith.constant 0 : index
    %c0_1 = arith.constant 0 : index
    %19 = vector.load %arg2[%c0_0, %c0_1] : memref<8x64xf32, #tpu.memory_space<vmem>>, vector<8x64xf32>
    %20 = arith.addf %19, %18 : vector<8x64xf32>
    %c0_2 = arith.constant 0 : index
    %c0_3 = arith.constant 0 : index
    %21 = vector.load %arg3[%c0_2, %c0_3] : memref<8x64xf32, #tpu.memory_space<vmem>>, vector<8x64xf32>
    tpu.vector_store %arg3[%c0_2, %c0_3], %20 {strides = array<i32>} : memref<8x64xf32, #tpu.memory_space<vmem>>, vector<8x64xf32>,
    return
  }
  func.func @transform_0(%arg0: i32, %arg1: memref<1xi32, #tpu.memory_space<smem>>) -> (i32, i32) {
    %c0_i32 = arith.constant 0 : i32
    %c0_i32_0 = arith.constant 0 : i32
    return %arg0, %c0_i32 : i32, i32
  }
  func.func @transform_1(%arg0: i32, %arg1: memref<1xi32, #tpu.memory_space<smem>>) -> (i32, i32) {
    %c0_i32 = arith.constant 0 : i32
    %c0_i32_0 = arith.constant 0 : i32
    return %arg0, %c0_i32 : i32, i32
  }
}

</mosaic_0001>

<bundles_post_ra>
// kernel: tpu_custom_call.1
= control target key start
LH: loop header
LB: loop body
LE: loop exit
PB: predicated region body
PF: predicated region fallthrough
CT: control target
= control target key end

     0   :  { %8 = vsyncpa [#allocation5], 0  ;;  %s418_s0 = inlined_call_operand.<no memory space> [shape: s32[1], index: 0, kind: input, shape index: {}]   ;;  %s419_s1 = inlined_call_operand.hbm [shape: f32[8,64], index: 1, kind: input, shape index: {}, may-alias: {1,2}]   ;;  %s420_s2 = inlined_call_operand.hbm [shape: f32[8,64], index: 2, kind: output, shape index: {}, may-alias: {1,2}]  }
   0x1   :  { %9 = vsyncpa [#allocation6], 0  ;;  %s346_s9 = smov [#allocation4]   ;;  %s298_s13 = scalar_lea.hbm %s419_s1, 128 }
   0x2   :  { %s16_s10 = sshll.u32 %s346_s9, 4  ;;  %p299_p0 = scmp.ne.s32.totalorder %s419_s1, %s298_s13  ;;  %s17_s10 = int_to_ptr.vmem [resolvable:$true] %s16_s10 }
   0x3   :  { %p302_p1 = scmp.lt.u32.totalorder %s298_s13, %s419_s1 }
   0x5   :  { %p304_p2 = pnand %p302_p1, %p299_p0 }
   0x7   :  { %307 = shalt.err (!%p304_p2)
}
   0x8   :  { %s308_s18 = scalar_lea.vmem %s17_s10, 128  ;;  %p313_p4 = scmp.lt.s32.totalorder %s17_s10, %s17_s10 }
   0x9   :  { %p309_p3 = scmp.ne.s32.totalorder %s17_s10, %s308_s18  ;;  %p314_p5 = scmp.lt.s32.totalorder %s308_s18, %s308_s18 }
   0xb   :  { %p315_p6 = por %p314_p5, %p313_p4 }
   0xd   :  { %p316_p7 = pnand %p315_p6, %p309_p3 }
   0xf   :  { %319 = shalt.err (!%p316_p7)
}
  0x10   :  { %19 = dma.hbm_to_vmem [thread:$0]  %s419_s1, 128, %s17_s10, [#allocation5]   ;;  %v26_v0 = vlaneseq }
  0x12   :  { %v32_v1 = vand.u32 127, %v26_v0 }
  0x13   :  { %342 = dma.done.wait [#allocation5], 128  }
  0x14   :  { %343 = vsyncadd [#allocation5], 4294967168  ;;  %v33_v2 = vcvt.s32.f32 %v32_v1  ;;  %v27_v5 = vshrl.u32 %v26_v0, 7  ;;  %v28_v6 = vstv %s418_s0  ;;  %v347_v22 = vmov 683565275   ;;  %s353_s0 = smov 32  }
  0x15   :  { %v348_v24 = vmov 2475754826   ;;  %v349_v26 = vmov 2131351028   ;;  %v350_v28 = vmov 2102212464  }
  0x16   :  { %v34_v3 = vmul.f32 -0.28782314, %v33_v2  ;;  %v29_v7 = vadd.s32 %v28_v6, %v27_v5  ;;  %v351_v30 = vmov 920167782   ;;  %v352_v37 = vmov 1326507024  }
  0x17   :  { %s354_s1 = smov [#allocation7]  }
  0x18   :  { %v35_v4 = vmul.f32 1.442695, %v34_v3  ;;  %v30_v8 = vcvt.s32.f32 %v29_v7  ;;  %s262_s23 = sshll.u32 %s354_s1, 4  ;;  %s263_s23 = int_to_ptr.vmem [resolvable:$true] %s262_s23 }
  0x19   :  { %s320_s24 = scalar_lea.vmem %s263_s23, 128  ;;  %p325_p9 = scmp.lt.s32.totalorder %s263_s23, %s263_s23 }
  0x1a   :  { %292 = vpow2.f32 %v35_v4  ;;  %p321_p8 = scmp.ne.s32.totalorder %s263_s23, %s320_s24  ;;  %p326_p10 = scmp.lt.s32.totalorder %s320_s24, %s320_s24 }
  0x1c   :  { %p327_p11 = por %p326_p10, %p325_p9 }
  0x1e   :  { %p328_p12 = pnand %p327_p11, %p321_p8 }
  0x24   :  { %v293_v9 = vpop.eup %292 }
  0x25   :  { %v385_v10 = vmul.f32 %v293_v9, %v30_v8 }
  0x27   :  { %v41_v11 = vand.u32 2139095040, %v385_v10  ;;  %v38_v13 = vand.u32 2147483647, %v385_v10  ;;  %vm40_vm7 = vcmp.lt.s32.totalorder %v385_v10, 0  ;;  %vm130_vm15 = vweird.f32 %v385_v10 }
  0x29   :  { %v42_v12 = vshrl.u32 %v41_v11, 23  ;;  %v45_v16 = vand.u32 8388607, %v38_v13  ;;  %vm39_vm8 = vcmp.le.f32.partialorder %v38_v13, 0.7853982 }
  0x2b   :  { %v271_v14 = vadd.s32 4294967169, %v42_v12  ;;  %v46_v19 = vor.u32 8388608, %v45_v16 }
  0x2d   :  { %v48_v15 = vadd.s32 1, %v271_v14  ;;  %v86_v39 = vshll.u32 %v46_v19, 8 }
  0x2f   :  { %vm49_vm0 = vcmp.gt.s32.totalorder %v48_v15, 0 }
  0x30   :  { %v50_v17 = vsel %vm49_vm0, %v48_v15, 0  ;;  %vm250_vm0 = vcmask 261120  }
  0x31   :  { %v52_v18 = vand.u32 31, %v50_v17  ;;  %v51_v20 = vshrl.u32 %v50_v17, 5 }
  0x33   :  { %v53_v21 = vsub.s32 32, %v52_v18  ;;  %v55_v23 = vshll.u32 %v347_v22, %v52_v18  ;;  %v58_v25 = vshll.u32 %v348_v24, %v52_v18  ;;  %v61_v27 = vshll.u32 %v349_v26, %v52_v18 }
  0x34   :  { %v64_v29 = vshll.u32 %v350_v28, %v52_v18  ;;  %v67_v31 = vshll.u32 %v351_v30, %v52_v18  ;;  %vm70_vm1 = vcmp.lt.s32.totalorder %v51_v20, 1  ;;  %vm73_vm2 = vcmp.lt.s32.totalorder %v51_v20, 4 }
  0x35   :  { %v54_v32 = vshrl.u32 %v347_v22, %v53_v21  ;;  %v56_v33 = vshrl.u32 %v348_v24, %v53_v21  ;;  %v59_v34 = vshrl.u32 %v349_v26, %v53_v21  ;;  %v62_v35 = vshrl.u32 %v350_v28, %v53_v21 }
  0x36   :  { %v65_v36 = vshrl.u32 %v351_v30, %v53_v21  ;;  %v68_v38 = vshrl.u32 %v352_v37, %v53_v21  ;;  %vm71_vm3 = vcmp.lt.s32.totalorder %v51_v20, 2  ;;  %vm72_vm4 = vcmp.lt.s32.totalorder %v51_v20, 3 }
  0x37   :  { %v57_v40 = vor.u32 %v56_v33, %v55_v23  ;;  %v60_v41 = vor.u32 %v59_v34, %v58_v25  ;;  %v63_v42 = vor.u32 %v62_v35, %v61_v27 }
  0x38   :  { %v66_v43 = vor.u32 %v65_v36, %v64_v29  ;;  %v69_v44 = vor.u32 %v68_v38, %v67_v31 }
  0x39   :  { %v74_v45 = vsel %vm70_vm1, %v54_v32, %v57_v40  ;;  %v75_v46 = vsel %vm73_vm2, %v63_v42, 2102212464  ;;  %v78_v47 = vsel %vm70_vm1, %v57_v40, %v60_v41  ;;  %v82_v48 = vsel %vm70_vm1, %v60_v41, %v63_v42 }
  0x3a   :  { %v76_v49 = vsel %vm72_vm4, %v60_v41, %v75_v46  ;;  %v79_v50 = vsel %vm73_vm2, %v66_v43, 920167782  ;;  %v83_v51 = vsel %vm73_vm2, %v69_v44, 1326507024  ;;  %vm254_vm1 = vcmask 523264  }
  0x3b   :  { %v80_v52 = vsel %vm72_vm4, %v63_v42, %v79_v50  ;;  %v84_v53 = vsel %vm72_vm4, %v66_v43, %v83_v51  ;;  %v77_v54 = vsel %vm71_vm3, %v74_v45, %v76_v49  ;;  %v252_v45 = vld [vmem:[#allocation4] sm:$0xff] }
  0x3c   :  { %v81_v55 = vsel %vm71_vm3, %v78_v47, %v80_v52  ;;  %v85_v56 = vsel %vm71_vm3, %v82_v48, %v84_v53  ;;  %v93_v61 = vmul.u32 %v86_v39, %v77_v54 }
  0x3d   :  { %v391_v57 = vmul.u32.u64.low %v86_v39, %v85_v56  ;;  %v392_v58 = vmul.u32.u64.high %v86_v39, %v85_v56, %v391_v57  ;;  %v394_v59 = vmul.u32.u64.low %v86_v39, %v81_v55  ;;  %v395_v60 = vmul.u32.u64.high %v86_v39, %v81_v55, %v394_v59 }
  0x3f   :  { %vm95_vm5 = vc.u32 %v392_v58, %v394_v59  ;;  %v96_v62 = vadd.s32 1, %v395_v60  ;;  %v94_v9 = vadd.s32 %v394_v59, %v392_v58 }
  0x41   :  { %v97_v63 = vsel %vm95_vm5, %v96_v62, %v395_v60 }
  0x42   :  { %v98_v0 = vadd.s32 %v97_v63, %v93_v61 }
  0x44   :  { %v99_v1 = vadd.s32 536870912, %v98_v0 }
  0x46   :  { %v100_v2 = vshrl.u32 %v99_v1, 30 }
  0x48   :  { %v101_v3 = vshll.u32 %v100_v2, 30  ;;  %v124_v23 = vsub.s32 4, %v100_v2 }
  0x4a   :  { %v102_v4 = vsub.s32 %v98_v0, %v101_v3  ;;  %v125_v26 = vsel %vm40_vm7, %v124_v23, %v100_v2 }
  0x4b   :  { %v127_v29 = vsel %vm39_vm8, 0, %v125_v26 }
  0x4c   :  { %v104_v5 = vsub.s32 0, %v102_v4  ;;  %v131_v30 = vadd.s32 3, %v127_v29  ;;  %v235_v32 = vand.u32 3, %v127_v29 }
  0x4e   :  { %v272_v6 = vmin.u32 %v104_v5, %v102_v4  ;;  %v132_v31 = vand.u32 3, %v131_v30  ;;  %vm240_vm10 = vcmp.eq.s32.totalorder %v235_v32, 2  ;;  %vm237_vm12 = vcmp.eq.s32.totalorder %v235_v32, 0 }
  0x4f   :  { %vm236_vm14 = vcmp.lt.s32.totalorder %v235_v32, 2 }
  0x50   :  { %v106_v7 = vclz %v272_v6  ;;  %vm137_vm9 = vcmp.eq.s32.totalorder %v132_v31, 2  ;;  %vm134_vm11 = vcmp.eq.s32.totalorder %v132_v31, 0  ;;  %vm133_vm13 = vcmp.lt.s32.totalorder %v132_v31, 2 }
  0x52   :  { %v273_v8 = vadd.s32 4294967294, %v106_v7 }
  0x54   :  { %vm274_vm6 = vcmp.lt.s32.totalorder %v273_v8, 0 }
  0x55   :  { %v109_v11 = vsel %vm274_vm6, 0, %v273_v8 }
  0x56   :  { %v110_v12 = vsub.s32 32, %v109_v11  ;;  %v111_v14 = vshll.u32 %v102_v4, %v109_v11  ;;  %v114_v15 = vsub.s32 4294967266, %v109_v11 }
  0x58   :  { %v112_v16 = vshrl.u32 %v94_v9, %v110_v12  ;;  %v115_v17 = vadd.s32 127, %v114_v15 }
  0x5a   :  { %v113_v18 = vor.u32 %v112_v16, %v111_v14  ;;  %v116_v19 = vshll.u32 %v115_v17, 23 }
  0x5c   :  { %v117_v20 = vor.u32 4788187, %v116_v19  ;;  %v120_v21 = vcvt.s32.f32 %v113_v18 }
  0x5e   :  { %v118_v22 = vand.u32 2147483647, %v117_v20 }
  0x60   :  { %v121_v24 = vmul.f32 %v120_v21, %v118_v22 }
  0x62   :  { %v122_v25 = vxor.u32 2147483648, %v121_v24 }
  0x64   :  { %v123_v27 = vsel %vm40_vm7, %v122_v25, %v121_v24 }
  0x65   :  { %v126_v28 = vsel %vm39_vm8, %v385_v10, %v123_v27 }
  0x66   :  { %294 = vcosq.f32 %v126_v28 }
  0x67   :  { %296 = vsinq.f32 %v126_v28 }
  0x70   :  { %v295_v33 = vpop.eup %294 }
  0x71   :  { %v297_v34 = vpop.eup %296  ;;  %v138_v35 = vxor.u32 2147483648, %v295_v33 }
  0x72   :  { %v135_v13 = vxor.u32 2147483648, %v297_v34 }
  0x73   :  { %v139_v36 = vsel %vm137_vm9, %v138_v35, %v297_v34  ;;  %v242_v37 = vsel %vm240_vm10, %v138_v35, %v297_v34 }
  0x74   :  { %v136_v38 = vsel %vm134_vm11, %v295_v33, %v135_v13  ;;  %v239_v39 = vsel %vm237_vm12, %v295_v33, %v135_v13 }
  0x75   :  { %v140_v40 = vsel %vm133_vm13, %v136_v38, %v139_v36  ;;  %v243_v41 = vsel %vm236_vm14, %v239_v39, %v242_v37 }
  0x76   :  { %v141_v42 = vsel %vm130_vm15, nan, %v140_v40  ;;  %v244_v43 = vsel %vm130_vm15, nan, %v243_v41 }
  0x77   :  { %v245_v44 = vadd.f32 %v244_v43, %v141_v42 }
  0x79   :  { %247 = vrot.lane.b32.xlu0 %v245_v44, %s353_s0 }
  0xeb   :  { %v248_v46 = vpop.permute.xlu0 %247 }
  0xec   :  { %v251_v47 = vsel %vm250_vm0, %v245_v44, %v248_v46 }
  0xed   :  { %v253_v48 = vadd.f32 %v252_v45, %v251_v47 }
  0xef   :  { %255 = vst.msk [vmem:[#allocation7] sm:$0xff] %vm254_vm1, %v253_v48 }
  0xf0   :  { %331 = shalt.err (!%p328_p12)
}
  0xf1   :  { %s332_s27 = scalar_lea.hbm %s420_s2, 128 }
  0xf2   :  { %p333_p13 = scmp.ne.s32.totalorder %s420_s2, %s332_s27  ;;  %p336_p0 = scmp.lt.u32.totalorder %s332_s27, %s420_s2 }
  0xf4   :  { %p338_p1 = pnand %p336_p0, %p333_p13 }
  0xf6   :  { %341 = shalt.err (!%p338_p1)
}
  0xf7   :  { %265 = dma.vmem_to_hbm [thread:$0]  %s263_s23, 128, %s420_s2, [#allocation6]  }
  0xf8   :  { %344 = dma.done.wait [#allocation6], 128  }
  0xf9   :  { %345 = vsyncadd [#allocation6], 4294967168 }
  0xfa   :  { %269 = vsyncpa [#allocation5], 1 }
  0xfb   :  { %270 = vsyncpa [#allocation6], 1 }

</bundles_post_ra>
